<compile_context>
chip_gen: v7x
topology: tpu7x:2x2x1
jax: 0.10.0
libtpu: 0.0.40
codegen_flags: <defaults>
</compile_context>

<pallas_src>
import functools

import jax
import jax.numpy as jnp
from jax.experimental import pallas as pl
from jax.experimental.pallas import tpu as pltpu


def _round_up(x: int, m: int) -> int:
    return ((x + m - 1) // m) * m


def _vmem_budget():
    """(target_tile_bytes, vmem_limit_bytes) based on physical VMEM."""
    try:
        cap = pltpu.get_tpu_info().vmem_capacity_bytes
    except Exception:
        cap = 64 << 20  # conservative (v7x-sized) fallback
    if cap >= (100 << 20):          # v5e / v6e: 128 MiB VMEM per TC
        return 8 << 20, 80 << 20
    return 4 << 20, 48 << 20        # v7x: 64 MiB VMEM per TC


def _choose_tiles(batch: int, n_labels: int, itemsize: int,
                  block_batch: int | None, block_labels: int | None,
                  target_tile_bytes: int):
    """Pick (tb, tn) honoring (sublane, 128) tiling rules; no padding needed."""
    sub = max(8, 32 // itemsize)        # 8 for f32, 16 for bf16, 32 for int8
    n_ceil = _round_up(n_labels, 128)
    b_ceil = _round_up(batch, sub)

    # --- label tile: large lane-dense tile; the ragged final tile is masked
    # in-kernel, so tn does NOT have to divide n_labels (never collapses to 128).
    if block_labels is not None:
        tn = int(block_labels)
        assert tn % 128 == 0, "block_labels must be a multiple of 128"
    else:
        tn = min(n_ceil, 8192)

    # --- batch tile: ~target_tile_bytes per input tile, sublane-aligned ---
    if block_batch is not None:
        tb = int(block_batch)
        assert tb % sub == 0, f"block_batch must be a multiple of {sub}"
    else:
        tb = max(sub, min(1024, (target_tile_bytes // (tn * itemsize)) // sub * sub))
        tb = min(tb, b_ceil)
        # Keep >= 2 tiles on the batch axis whenever possible: it is the
        # "parallel" axis and the only one sharded across the two TensorCores
        # on v7x (harmless slight reduction on single-TC v5e/v6e).
        if b_ceil > sub:
            tb = min(tb, max(sub, (b_ceil // 2) // sub * sub))
    return tb, tn


def _tdist_ce_kernel(logits_ref, targets_ref, out_ref,
                     m_sc, l_sc, s_sc, d_sc, u_sc,
                     *, epsilon: float, n_valid: int, tn: int,
                     mask_labels: bool, single_label_tile: bool):
    j = pl.program_id(1)
    n_j = pl.num_programs(1)

    @pl.when(j == 0)
    def _init():
        m_sc[...] = jnp.full(m_sc.shape, -jnp.inf, jnp.float32)
        l_sc[...] = jnp.zeros_like(l_sc)
        s_sc[...] = jnp.zeros_like(s_sc)
        d_sc[...] = jnp.zeros_like(d_sc)
        u_sc[...] = jnp.zeros_like(u_sc)

    logits = logits_ref[...].astype(jnp.float32)    # (tb, tn)
    targets = targets_ref[...].astype(jnp.float32)  # (tb, tn)

    def _step(lg_max, lg_sum, tg):
        # --- online log-sum-exp over label tiles ---
        m_prev = m_sc[...]
        m_new = jnp.maximum(m_prev, jnp.max(lg_max, axis=-1, keepdims=True))
        alpha = jnp.exp(m_prev - m_new)
        p = jnp.exp(lg_max - m_new)
        l_sc[...] = alpha * l_sc[...] + jnp.sum(p, axis=-1, keepdims=True)
        m_sc[...] = m_new
        # --- partial sums for the folded cross-entropy ---
        s_sc[...] += jnp.sum(tg, axis=-1, keepdims=True)            # sum targets
        d_sc[...] += jnp.sum(tg * lg_sum, axis=-1, keepdims=True)   # sum targets*logits
        u_sc[...] += jnp.sum(lg_sum, axis=-1, keepdims=True)        # sum logits (uniform)

    def _masked_args():
        # Mask BOTH logits and targets: out-of-bounds columns of the ragged
        # final tile contain arbitrary data (no wrapper-side padding).
        neg_big = float(jnp.finfo(jnp.float32).min)
        col = j * tn + jax.lax.broadcasted_iota(jnp.int32, (1, tn), 1)
        valid = col < n_valid
        return (jnp.where(valid, logits, neg_big),   # no LSE contribution
                jnp.where(valid, logits, 0.0),       # no sum contribution
                jnp.where(valid, targets, 0.0))      # no target-sum contribution

    if not mask_labels:
        _step(logits, logits, targets)
    elif single_label_tile:
        _step(*_masked_args())
    else:
        # Only the final label tile pays the mask cost.
        @pl.when(j < n_j - 1)
        def _full_tile():
            _step(logits, logits, targets)

        @pl.when(j == n_j - 1)
        def _ragged_tile():
            _step(*_masked_args())

    @pl.when(j == n_j - 1)
    def _finalize():
        # ce = lse * sum(tdist) - sum(tdist * logits)
        lse = m_sc[...] + jnp.log(l_sc[...])
        s = s_sc[...]
        inv = pl.reciprocal(s + epsilon, approx=False)          # (tb, 1) divide
        ce_multi = (s * inv) * lse - d_sc[...] * inv            # targets/(s+eps) branch
        ce_unif = lse - u_sc[...] * jnp.float32(1.0 / n_valid)  # uniform 1/N branch
        out_ref[...] = jnp.where(s == 0.0, ce_unif, ce_multi)


def target_distribution_criterion(
    logits: jax.Array,
    targets: jax.Array,
    *,
    reduction: str = "none",
    epsilon: float = 1e-8,
    block_batch: int | None = None,
    block_labels: int | None = None,
) -> jax.Array:
    """Pallas implementation of TargetDistributionCriterion.forward."""
    assert reduction in ("none", "mean")
    assert logits.shape == targets.shape and logits.ndim == 2
    batch, n_labels = logits.shape

    itemsize = max(jnp.dtype(logits.dtype).itemsize, jnp.dtype(targets.dtype).itemsize)
    target_tile_bytes, vmem_limit = _vmem_budget()
    tb, tn = _choose_tiles(batch, n_labels, itemsize,
                           block_batch, block_labels, target_tile_bytes)

    n_batch_tiles = pl.cdiv(batch, tb)
    n_label_tiles = pl.cdiv(n_labels, tn)
    grid = (n_batch_tiles, n_label_tiles)

    kernel = functools.partial(
        _tdist_ce_kernel,
        epsilon=float(epsilon),
        n_valid=n_labels,
        tn=tn,
        mask_labels=(n_labels % tn != 0),
        single_label_tile=(n_label_tiles == 1),
    )

    out2d = pl.pallas_call(
        kernel,
        out_shape=jax.ShapeDtypeStruct((batch, 1), jnp.float32),
        grid_spec=pltpu.PrefetchScalarGridSpec(
            num_scalar_prefetch=0,
            grid=grid,
            in_specs=[
                pl.BlockSpec((tb, tn), lambda i, j: (i, j)),
                pl.BlockSpec((tb, tn), lambda i, j: (i, j)),
            ],
            out_specs=pl.BlockSpec((tb, 1), lambda i, j: (i, 0)),
            scratch_shapes=[pltpu.VMEM((tb, 1), jnp.float32) for _ in range(5)],
        ),
        compiler_params=pltpu.CompilerParams(
            dimension_semantics=("parallel", "arbitrary"),
            vmem_limit_bytes=vmem_limit,
        ),
    )(logits, targets)

    ce = out2d[:, 0]
    if reduction == "mean":
        ce = jnp.mean(ce)
    return ce


def _reference(logits, targets, epsilon=1e-8, reduction="none"):
    """Pure-JAX reference mirroring the PyTorch module."""
    targets = targets.astype(jnp.float32)
    logits = logits.astype(jnp.float32)
    n = targets.shape[-1]
    s = jnp.sum(targets, axis=-1, keepdims=True)
    tdist = jnp.where(s == 0, 1.0 / n, targets / (s + epsilon))
    log_sm = jax.nn.log_softmax(logits, axis=-1)
    ce = -jnp.sum(tdist * log_sm, axis=-1)
    if reduction == "mean":
        ce = jnp.mean(ce)
    return ce


if __name__ == "__main__":
    key = jax.random.PRNGKey(0)
    k1, k2, k3, k4, k5, k6 = jax.random.split(key, 6)

    # Case 1: un-aligned shapes, single ragged label tile + ragged batch tile.
    b1, n1 = 10, 200
    logits1 = jax.random.normal(k1, (b1, n1), dtype=jnp.float32)
    targets1 = (jax.random.uniform(k2, (b1, n1)) > 0.7).astype(jnp.float32)
    targets1 = targets1.at[0].set(0.0)  # all-zero row -> uniform branch

    out1 = jax.block_until_ready(
        target_distribution_criterion(logits1, targets1, reduction="none"))
    ref1 = _reference(logits1, targets1, reduction="none")
    assert out1.shape == (b1,)
    assert jnp.allclose(out1, ref1, atol=1e-4, rtol=1e-4)

    # Case 2: multi-step grid on both axes, fully aligned (online-LSE path,
    # no masking anywhere).
    b2, n2 = 16, 256
    logits2 = jax.random.normal(k3, (b2, n2), dtype=jnp.float32)
    targets2 = (jax.random.uniform(k4, (b2, n2)) > 0.8).astype(jnp.float32)
    targets2 = targets2.at[3].set(0.0)

    out2 = jax.block_until_ready(
        target_distribution_criterion(logits2, targets2, reduction="none",
                                      block_batch=8, block_labels=128))
    ref2 = _reference(logits2, targets2, reduction="none")
    assert jnp.allclose(out2, ref2, atol=1e-4, rtol=1e-4)

    # Case 3: multiple label tiles with a ragged final tile (mask only on the
    # last tile via pl.when) + ragged batch tile.
    b3, n3 = 12, 300
    logits3 = jax.random.normal(k5, (b3, n3), dtype=jnp.float32)
    targets3 = (jax.random.uniform(k6, (b3, n3)) > 0.75).astype(jnp.float32)
    targets3 = targets3.at[5].set(0.0)

    out3 = jax.block_until_ready(
        target_distribution_criterion(logits3, targets3, reduction="none",
                                      block_batch=8, block_labels=128))
    ref3 = _reference(logits3, targets3, reduction="none")
    assert out3.shape == (b3,)
    assert jnp.allclose(out3, ref3, atol=1e-4, rtol=1e-4)

    # Case 4: mean reduction.
    out4 = jax.block_until_ready(
        target_distribution_criterion(logits3, targets3, reduction="mean",
                                      block_batch=8, block_labels=128))
    ref4 = _reference(logits3, targets3, reduction="mean")
    assert jnp.allclose(out4, ref4, atol=1e-4, rtol=1e-4)

    print("KERNEL_OK")
</pallas_src>

<mosaic_0001>
module attributes {stable_mosaic.version = 11 : i64} {
  func.func @_tdist_ce_kernel(%arg0: i32, %arg1: i32, %arg2: memref<8x256xf32, #tpu.memory_space<vmem>>, %arg3: memref<8x256xf32, #tpu.memory_space<vmem>>, %arg4: memref<8x1xf32, #tpu.memory_space<vmem>>, %arg5: memref<8x1xf32, #tpu.memory_space<vmem>>, %arg6: memref<8x1xf32, #tpu.memory_space<vmem>>, %arg7: memref<8x1xf32, #tpu.memory_space<vmem>>, %arg8: memref<8x1xf32, #tpu.memory_space<vmem>>, %arg9: memref<8x1xf32, #tpu.memory_space<vmem>>) attributes {dimension_semantics = [#tpu.dimension_semantics<parallel>, #tpu.dimension_semantics<arbitrary>], iteration_bounds = array<i64: 2, 1>, scalar_prefetch = 0 : i64, scratch_operands = 5 : i64, tpu.core_type = #tpu.core_type<tc>, window_params = [{transform_indices = @transform_0, window_bounds = array<i64: 8, 256>}, {transform_indices = @transform_1, window_bounds = array<i64: 8, 256>}, {transform_indices = @transform_2, window_bounds = array<i64: 8, 1>}]} {
    %c0_i32 = arith.constant 0 : i32
    %0 = arith.cmpi eq, %arg1, %c0_i32 : i32
    %1 = arith.extui %0 : i1 to i32
    %c0_i32_0 = arith.constant 0 : i32
    %2 = arith.cmpi ne, %1, %c0_i32_0 : i32
    scf.if %2 {
      %cst_33 = arith.constant 0xFF800000 : f32
      %58 = vector.broadcast %cst_33 : f32 to vector<8x1xf32>
      %c0_34 = arith.constant 0 : index
      %c0_35 = arith.constant 0 : index
      %59 = vector.load %arg5[%c0_34, %c0_35] : memref<8x1xf32, #tpu.memory_space<vmem>>, vector<8x1xf32>
      tpu.vector_store %arg5[%c0_34, %c0_35], %58 {strides = array<i32>} : memref<8x1xf32, #tpu.memory_space<vmem>>, vector<8x1xf32>,
      %cst_36 = arith.constant 0.000000e+00 : f32
      %60 = vector.broadcast %cst_36 : f32 to vector<8x1xf32>
      %c0_37 = arith.constant 0 : index
      %c0_38 = arith.constant 0 : index
      %61 = vector.load %arg6[%c0_37, %c0_38] : memref<8x1xf32, #tpu.memory_space<vmem>>, vector<8x1xf32>
      tpu.vector_store %arg6[%c0_37, %c0_38], %60 {strides = array<i32>} : memref<8x1xf32, #tpu.memory_space<vmem>>, vector<8x1xf32>,
      %cst_39 = arith.constant 0.000000e+00 : f32
      %62 = vector.broadcast %cst_39 : f32 to vector<8x1xf32>
      %c0_40 = arith.constant 0 : index
      %c0_41 = arith.constant 0 : index
      %63 = vector.load %arg7[%c0_40, %c0_41] : memref<8x1xf32, #tpu.memory_space<vmem>>, vector<8x1xf32>
      tpu.vector_store %arg7[%c0_40, %c0_41], %62 {strides = array<i32>} : memref<8x1xf32, #tpu.memory_space<vmem>>, vector<8x1xf32>,
      %cst_42 = arith.constant 0.000000e+00 : f32
      %64 = vector.broadcast %cst_42 : f32 to vector<8x1xf32>
      %c0_43 = arith.constant 0 : index
      %c0_44 = arith.constant 0 : index
      %65 = vector.load %arg8[%c0_43, %c0_44] : memref<8x1xf32, #tpu.memory_space<vmem>>, vector<8x1xf32>
      tpu.vector_store %arg8[%c0_43, %c0_44], %64 {strides = array<i32>} : memref<8x1xf32, #tpu.memory_space<vmem>>, vector<8x1xf32>,
      %cst_45 = arith.constant 0.000000e+00 : f32
      %66 = vector.broadcast %cst_45 : f32 to vector<8x1xf32>
      %c0_46 = arith.constant 0 : index
      %c0_47 = arith.constant 0 : index
      %67 = vector.load %arg9[%c0_46, %c0_47] : memref<8x1xf32, #tpu.memory_space<vmem>>, vector<8x1xf32>
      tpu.vector_store %arg9[%c0_46, %c0_47], %66 {strides = array<i32>} : memref<8x1xf32, #tpu.memory_space<vmem>>, vector<8x1xf32>,
    } else {
    }
    %c0 = arith.constant 0 : index
    %c0_1 = arith.constant 0 : index
    %3 = vector.load %arg2[%c0, %c0_1] : memref<8x256xf32, #tpu.memory_space<vmem>>, vector<8x256xf32>
    %c0_2 = arith.constant 0 : index
    %c0_3 = arith.constant 0 : index
    %4 = vector.load %arg3[%c0_2, %c0_3] : memref<8x256xf32, #tpu.memory_space<vmem>>, vector<8x256xf32>
    %c256_i32 = arith.constant 256 : i32
    %5 = arith.muli %arg1, %c256_i32 : i32
    %6 = tpu.iota {dimensions = array<i32: 1>} : vector<1x256xi32>
    %7 = vector.broadcast %5 : i32 to vector<1x256xi32>
    %8 = arith.addi %7, %6 : vector<1x256xi32>
    %c200_i32 = arith.constant 200 : i32
    %9 = vector.broadcast %c200_i32 : i32 to vector<1x256xi32>
    %10 = arith.cmpi slt, %8, %9 : vector<1x256xi32>
    %cst = arith.constant -3.40282347E+38 : f32
    %11 = vector.shape_cast %10 : vector<1x256xi1> to vector<1x256xi1>
    %12 = vector.broadcast %11 : vector<1x256xi1> to vector<8x256xi1>
    %13 = vector.broadcast %cst : f32 to vector<8x256xf32>
    %14 = arith.select %12, %3, %13 : vector<8x256xi1>, vector<8x256xf32>
    %cst_4 = arith.constant 0.000000e+00 : f32
    %15 = vector.shape_cast %10 : vector<1x256xi1> to vector<1x256xi1>
    %16 = vector.broadcast %15 : vector<1x256xi1> to vector<8x256xi1>
    %17 = vector.broadcast %cst_4 : f32 to vector<8x256xf32>
    %18 = arith.select %16, %3, %17 : vector<8x256xi1>, vector<8x256xf32>
    %cst_5 = arith.constant 0.000000e+00 : f32
    %19 = vector.shape_cast %10 : vector<1x256xi1> to vector<1x256xi1>
    %20 = vector.broadcast %19 : vector<1x256xi1> to vector<8x256xi1>
    %21 = vector.broadcast %cst_5 : f32 to vector<8x256xf32>
    %22 = arith.select %20, %4, %21 : vector<8x256xi1>, vector<8x256xf32>
    %c0_6 = arith.constant 0 : index
    %c0_7 = arith.constant 0 : index
    %23 = vector.load %arg5[%c0_6, %c0_7] : memref<8x1xf32, #tpu.memory_space<vmem>>, vector<8x1xf32>
    %cst_8 = arith.constant dense<0xFF800000> : vector<8xf32>
    %24 = vector.multi_reduction <maximumf>, %14, %cst_8 [1] : vector<8x256xf32> to vector<8xf32>
    %25 = vector.shape_cast %24 : vector<8xf32> to vector<8x1xf32>
    %26 = arith.maximumf %23, %25 : vector<8x1xf32>
    %27 = arith.subf %23, %26 : vector<8x1xf32>
    %28 = math.exp %27 : vector<8x1xf32>
    %29 = vector.broadcast %26 : vector<8x1xf32> to vector<8x256xf32>
    %30 = arith.subf %14, %29 : vector<8x256xf32>
    %31 = math.exp %30 : vector<8x256xf32>
    %c0_9 = arith.constant 0 : index
    %c0_10 = arith.constant 0 : index
    %32 = vector.load %arg6[%c0_9, %c0_10] : memref<8x1xf32, #tpu.memory_space<vmem>>, vector<8x1xf32>
    %33 = arith.mulf %28, %32 : vector<8x1xf32>
    %cst_11 = arith.constant dense<0.000000e+00> : vector<8xf32>
    %34 = vector.multi_reduction <add>, %31, %cst_11 [1] : vector<8x256xf32> to vector<8xf32>
    %35 = vector.shape_cast %34 : vector<8xf32> to vector<8x1xf32>
    %36 = arith.addf %33, %35 : vector<8x1xf32>
    %c0_12 = arith.constant 0 : index
    %c0_13 = arith.constant 0 : index
    %37 = vector.load %arg6[%c0_12, %c0_13] : memref<8x1xf32, #tpu.memory_space<vmem>>, vector<8x1xf32>
    tpu.vector_store %arg6[%c0_12, %c0_13], %36 {strides = array<i32>} : memref<8x1xf32, #tpu.memory_space<vmem>>, vector<8x1xf32>,
    %c0_14 = arith.constant 0 : index
    %c0_15 = arith.constant 0 : index
    %38 = vector.load %arg5[%c0_14, %c0_15] : memref<8x1xf32, #tpu.memory_space<vmem>>, vector<8x1xf32>
    tpu.vector_store %arg5[%c0_14, %c0_15], %26 {strides = array<i32>} : memref<8x1xf32, #tpu.memory_space<vmem>>, vector<8x1xf32>,
    %c0_16 = arith.constant 0 : index
    %c0_17 = arith.constant 0 : index
    %39 = vector.load %arg7[%c0_16, %c0_17] : memref<8x1xf32, #tpu.memory_space<vmem>>, vector<8x1xf32>
    %cst_18 = arith.constant dense<0.000000e+00> : vector<8xf32>
    %40 = vector.multi_reduction <add>, %22, %cst_18 [1] : vector<8x256xf32> to vector<8xf32>
    %41 = vector.shape_cast %40 : vector<8xf32> to vector<8x1xf32>
    %42 = arith.addf %39, %41 : vector<8x1xf32>
    %c0_19 = arith.constant 0 : index
    %c0_20 = arith.constant 0 : index
    %43 = vector.load %arg7[%c0_19, %c0_20] : memref<8x1xf32, #tpu.memory_space<vmem>>, vector<8x1xf32>
    tpu.vector_store %arg7[%c0_19, %c0_20], %42 {strides = array<i32>} : memref<8x1xf32, #tpu.memory_space<vmem>>, vector<8x1xf32>,
    %c0_21 = arith.constant 0 : index
    %c0_22 = arith.constant 0 : index
    %44 = vector.load %arg8[%c0_21, %c0_22] : memref<8x1xf32, #tpu.memory_space<vmem>>, vector<8x1xf32>
    %45 = arith.mulf %22, %18 : vector<8x256xf32>
    %cst_23 = arith.constant dense<0.000000e+00> : vector<8xf32>
    %46 = vector.multi_reduction <add>, %45, %cst_23 [1] : vector<8x256xf32> to vector<8xf32>
    %47 = vector.shape_cast %46 : vector<8xf32> to vector<8x1xf32>
    %48 = arith.addf %44, %47 : vector<8x1xf32>
    %c0_24 = arith.constant 0 : index
    %c0_25 = arith.constant 0 : index
    %49 = vector.load %arg8[%c0_24, %c0_25] : memref<8x1xf32, #tpu.memory_space<vmem>>, vector<8x1xf32>
    tpu.vector_store %arg8[%c0_24, %c0_25], %48 {strides = array<i32>} : memref<8x1xf32, #tpu.memory_space<vmem>>, vector<8x1xf32>,
    %c0_26 = arith.constant 0 : index
    %c0_27 = arith.constant 0 : index
    %50 = vector.load %arg9[%c0_26, %c0_27] : memref<8x1xf32, #tpu.memory_space<vmem>>, vector<8x1xf32>
    %cst_28 = arith.constant dense<0.000000e+00> : vector<8xf32>
    %51 = vector.multi_reduction <add>, %18, %cst_28 [1] : vector<8x256xf32> to vector<8xf32>
    %52 = vector.shape_cast %51 : vector<8xf32> to vector<8x1xf32>
    %53 = arith.addf %50, %52 : vector<8x1xf32>
    %c0_29 = arith.constant 0 : index
    %c0_30 = arith.constant 0 : index
    %54 = vector.load %arg9[%c0_29, %c0_30] : memref<8x1xf32, #tpu.memory_space<vmem>>, vector<8x1xf32>
    tpu.vector_store %arg9[%c0_29, %c0_30], %53 {strides = array<i32>} : memref<8x1xf32, #tpu.memory_space<vmem>>, vector<8x1xf32>,
    %c0_i32_31 = arith.constant 0 : i32
    %55 = arith.cmpi eq, %arg1, %c0_i32_31 : i32
    %56 = arith.extui %55 : i1 to i32
    %c0_i32_32 = arith.constant 0 : i32
    %57 = arith.cmpi ne, %56, %c0_i32_32 : i32
    scf.if %57 {
      %c0_33 = arith.constant 0 : index
      %c0_34 = arith.constant 0 : index
      %58 = vector.load %arg5[%c0_33, %c0_34] : memref<8x1xf32, #tpu.memory_space<vmem>>, vector<8x1xf32>
      %c0_35 = arith.constant 0 : index
      %c0_36 = arith.constant 0 : index
      %59 = vector.load %arg6[%c0_35, %c0_36] : memref<8x1xf32, #tpu.memory_space<vmem>>, vector<8x1xf32>
      %60 = math.log %59 : vector<8x1xf32>
      %61 = arith.addf %58, %60 : vector<8x1xf32>
      %c0_37 = arith.constant 0 : index
      %c0_38 = arith.constant 0 : index
      %62 = vector.load %arg7[%c0_37, %c0_38] : memref<8x1xf32, #tpu.memory_space<vmem>>, vector<8x1xf32>
      %cst_39 = arith.constant 9.99999993E-9 : f32
      %63 = vector.broadcast %cst_39 : f32 to vector<8x1xf32>
      %64 = arith.addf %62, %63 : vector<8x1xf32>
      %65 = tpu.reciprocal %64 : vector<8x1xf32> -> vector<8x1xf32>
      %66 = arith.mulf %62, %65 : vector<8x1xf32>
      %67 = arith.mulf %66, %61 : vector<8x1xf32>
      %c0_40 = arith.constant 0 : index
      %c0_41 = arith.constant 0 : index
      %68 = vector.load %arg8[%c0_40, %c0_41] : memref<8x1xf32, #tpu.memory_space<vmem>>, vector<8x1xf32>
      %69 = arith.mulf %68, %65 : vector<8x1xf32>
      %70 = arith.subf %67, %69 : vector<8x1xf32>
      %c0_42 = arith.constant 0 : index
      %c0_43 = arith.constant 0 : index
      %71 = vector.load %arg9[%c0_42, %c0_43] : memref<8x1xf32, #tpu.memory_space<vmem>>, vector<8x1xf32>
      %cst_44 = arith.constant 5.000000e-03 : f32
      %72 = vector.broadcast %cst_44 : f32 to vector<8x1xf32>
      %73 = arith.mulf %71, %72 : vector<8x1xf32>
      %74 = arith.subf %61, %73 : vector<8x1xf32>
      %cst_45 = arith.constant 0.000000e+00 : f32
      %75 = vector.broadcast %cst_45 : f32 to vector<8x1xf32>
      %76 = arith.cmpf oeq, %62, %75 : vector<8x1xf32>
      %77 = arith.select %76, %74, %70 : vector<8x1xi1>, vector<8x1xf32>
      %c0_46 = arith.constant 0 : index
      %c0_47 = arith.constant 0 : index
      %78 = vector.load %arg4[%c0_46, %c0_47] : memref<8x1xf32, #tpu.memory_space<vmem>>, vector<8x1xf32>
      tpu.vector_store %arg4[%c0_46, %c0_47], %77 {strides = array<i32>} : memref<8x1xf32, #tpu.memory_space<vmem>>, vector<8x1xf32>,
    } else {
    }
    return
  }
  func.func @transform_0(%arg0: i32, %arg1: i32) -> (i32, i32) {
    %c0_i32 = arith.constant 0 : i32
    return %arg0, %arg1 : i32, i32
  }
  func.func @transform_1(%arg0: i32, %arg1: i32) -> (i32, i32) {
    %c0_i32 = arith.constant 0 : i32
    return %arg0, %arg1 : i32, i32
  }
  func.func @transform_2(%arg0: i32, %arg1: i32) -> (i32, i32) {
    %c0_i32 = arith.constant 0 : i32
    %c0_i32_0 = arith.constant 0 : i32
    return %arg0, %c0_i32 : i32, i32
  }
}

</mosaic_0001>

<bundles_post_ra>
// kernel: tpu_custom_call.1
= control target key start
LH: loop header
LB: loop body
LE: loop exit
PB: predicated region body
PF: predicated region fallthrough
CT: control target
= control target key end

     0   :  { %7 = vsyncpa [#allocation8], 0  ;;  %s843_s0 = inlined_call_operand.hbm [shape: f32[10,200], index: 0, kind: input, shape index: {}]   ;;  %s844_s1 = inlined_call_operand.hbm [shape: f32[10,200], index: 1, kind: input, shape index: {}]   ;;  %s845_s2 = inlined_call_operand.vmem [shape: f32[10,1], index: 2, kind: output, shape index: {}]  }
   0x1   :  { %9 = vsyncpa [#allocation8 + $0x1], 0 }
   0x2   :  { %10 = vsyncpa [#allocation10], 0 }
   0x3   :  { %12 = vsyncpa [#allocation10 + $0x1], 0  ;;  %s653_s9 = smov 0   ;;  %s655_s10 = smov 0  }
   0x4   :  { %s657_s11 = smov 0   ;;  %s659_s12 = smov 0  }
   0x5   :  { %s661_s13 = smov 0   ;;  %s663_s14 = smov 0  }
   0x6 LB: > { %s425_s15 = sadd.s32 4294967295, %s631_s14   ;;  %s30_s16 = sadd.s32 1, %s627_s13  ;;  %s631_s14 = sphi %s663_s14, %s18_s14   ;;  %s627_s13 = sphi %s661_s13, %s859_s13   ;;  %s623_s12 = sphi %s659_s12, %s858_s12   ;;  %s619_s11 = sphi %s657_s11, %s857_s11   ;;  %s615_s10 = sphi %s655_s10, %s856_s10   ;;  %s611_s9 = sphi %s653_s9, %s855_s9  }
   0x7   : > { %p32_p0 = scmp.ge.s32.totalorder %s30_s16, 2  ;;  %s39_s17 = sadd.s32 1, %s619_s11 }
   0x8   : > { %p46_p1 = scmp.ne.s32.totalorder %s619_s11, %s615_s10  ;;  %p47_p2 = scmp.eq.s32.totalorder %s631_s14, 0 }
   0x9   : > { %s861_s16 = smov (%p32_p0, %s30_s16), 0  ;;  %p52_p4 = scmp.ne.s32.totalorder %s615_s10, %s611_s9 }
   0xa   : > { %p689_p3 = por %p47_p2, %p46_p1  ;;  %s34_s19 = ssub.s32 %s627_s13, %s861_s16 }
   0xb   : > { %p53_p5 = scmp.eq.s32.totalorder %s425_s15, 0  ;;  %p37_p6 = scmp.eq.s32.totalorder %s34_s19, 0 }
   0xc   : > { %p454_p8 = scmp.lt.s32.totalorder %s631_s14, 2  ;;  %s705_s22 = sand.u32 1, %s619_s11  }
   0xd   : > { %p696_p7 = por %p53_p5, %p52_p4  ;;  %s441_s23 = sshll.u32 %s627_s13, 8 }
   0xe   : > { %s702_s21 = scalar_select %p37_p6, %s619_s11, %s39_s17  }
   0xf   : > { %s848_s20 = scalar_select %p696_p7, 1, 0 }
  0x10   : > { %s429_s24 = sshll.u32 %s705_s22, 4  ;;  %s714_s27 = scalar_lea.hbm %s843_s0, %s441_s23 }
  0x11   : > { %s134_s28 = scalar_lea.vmem [#allocation7], %s429_s24  ;;  %p720_p9 = pnand %p454_p8, %p689_p3 }
  0x12   : > { %s144_s29 = sshll.u32 %s134_s28, 4  ;;  %s131_s3 = scalar_lea.sflag [#allocation8], %s705_s22  ;;  %s724_s29 = int_to_ptr.vmem [resolvable:$true] %s144_s29 }
  0x13   : > { %s517_s4 = scalar_lea.hbm %s714_s27, 256  ;;  %p519_p13 = pneg %p720_p9 }
  0x14   : > { %p518_p12 = scmp.ne.s32.totalorder %s714_s27, %s517_s4  ;;  %s522_s7 = scalar_lea.hbm %s843_s0, 512 }
  0x15   : > { %p523_p2 = scmp.lt.u32.totalorder %s714_s27, %s843_s0  ;;  %p524_p3 = scmp.lt.u32.totalorder %s522_s7, %s517_s4 }
  0x16   : > { %p520_p0 = pnand %p519_p13, %p518_p12  ;;  %p526_p5 = scmp.lt.u32.totalorder %s517_s4, %s714_s27 }
  0x17   : > { %p525_p4 = por %p524_p3, %p523_p2 }
  0x18   : > { %p521_p1 = pneg %p520_p0 }
  0x19   : > { %p527_p6 = por %p526_p5, %p525_p4 }
  0x1b   : > { %p528_p8 = pnand %p527_p6, %p521_p1 }
  0x1d   : > { %531 = shalt.err (!%p528_p8)
}
  0x1e   : > { %s532_s15 = scalar_lea.vmem %s724_s29, 256  ;;  %s633_s17 = smov [#allocation7]  }
  0x1f   : > { %p533_p12 = scmp.ne.s32.totalorder %s724_s29, %s532_s15  ;;  %s537_s18 = sshll.u32 %s633_s17, 4  ;;  %s538_s18 = int_to_ptr.vmem [resolvable:$false] %s537_s18 }
  0x20   : > { %s539_s19 = scalar_lea.vmem %s538_s18, 512  ;;  %p540_p11 = scmp.lt.s32.totalorder %s724_s29, %s538_s18 }
  0x21   : > { %p535_p0 = pnand %p533_p12, %p519_p13  ;;  %p541_p2 = scmp.lt.s32.totalorder %s539_s19, %s532_s15 }
  0x23   : > { %p536_p10 = pneg %p535_p0  ;;  %p542_p3 = por %p541_p2, %p540_p11 }
  0x25   : > { %p543_p4 = pnand %p542_p3, %p536_p10 }
  0x27   : > { %546 = shalt.err (!%p543_p4)
}
  0x28   : > { %450 = dma.hbm_to_vmem [thread:$0]  (!%p720_p9), %s714_s27, 256, %s724_s29, %s131_s3  }
  0x29   : > { %p850_p1 = scmp.lt.s32.totalorder %s631_s14, 3  ;;  %p851_p5 = scmp.ge.s32.totalorder %s631_s14, 1 }
  0x2a   : > { %s767_s4 = scalar_lea.hbm %s844_s1, %s441_s23  ;;  %s155_s5 = scalar_lea.vmem [#allocation9], %s429_s24 }
  0x2b   : > { %p758_p6 = pnand %p851_p5, %p850_p1  ;;  %s165_s6 = sshll.u32 %s155_s5, 4  ;;  %s166_s6 = int_to_ptr.vmem [resolvable:$true] %s165_s6 }
  0x2c   : > { %s152_s27 = scalar_lea.sflag [#allocation10], %s705_s22  ;;  %s547_s29 = scalar_lea.hbm %s767_s4, 256 }
  0x2d   : > { %s852_s25 = scalar_select %p758_p6, 1, 0 }
  0x2e   : > { %p548_p10 = scmp.ne.s32.totalorder %s767_s4, %s547_s29  ;;  %s552_s23 = scalar_lea.hbm %s844_s1, 512 }
  0x2f   : > { %p553_p12 = scmp.lt.u32.totalorder %s767_s4, %s844_s1  ;;  %p554_p0 = scmp.lt.u32.totalorder %s552_s23, %s547_s29 }
  0x30   : > { %p550_p11 = pnand %p548_p10, %p519_p13  ;;  %p556_p3 = scmp.lt.u32.totalorder %s547_s29, %s767_s4 }
  0x31   : > { %p555_p2 = por %p554_p0, %p553_p12 }
  0x32   : > { %p551_p8 = pneg %p550_p11 }
  0x33   : > { %p557_p4 = por %p556_p3, %p555_p2 }
  0x35   : > { %p558_p1 = pnand %p557_p4, %p551_p8 }
  0x37   : > { %561 = shalt.err (!%p558_p1)
}
  0x38   : > { %s562_s22 = scalar_lea.vmem %s166_s6, 256  ;;  %s634_s24 = smov [#allocation9]  }
  0x39   : > { %p563_p5 = scmp.ne.s32.totalorder %s166_s6, %s562_s22  ;;  %s567_s15 = sshll.u32 %s634_s24, 4  ;;  %s568_s15 = int_to_ptr.vmem [resolvable:$false] %s567_s15 }
  0x3a   : > { %s569_s17 = scalar_lea.vmem %s568_s15, 512  ;;  %p570_p7 = scmp.lt.s32.totalorder %s166_s6, %s568_s15 }
  0x3b   : > { %p565_p10 = pnand %p563_p5, %p519_p13  ;;  %p571_p6 = scmp.lt.s32.totalorder %s569_s17, %s562_s22 }
  0x3d   : > { %p566_p11 = pneg %p565_p10  ;;  %p572_p0 = por %p571_p6, %p570_p7 }
  0x3f   : > { %p573_p12 = pnand %p572_p0, %p566_p11 }
  0x41   : > { %576 = shalt.err (!%p573_p12)
}
  0x42   : > { %453 = dma.hbm_to_vmem [thread:$0]  (!%p720_p9), %s767_s4, 256, %s166_s6, %s152_s27  }
  0x43   : > { %p853_p8 = scmp.ne.s32.totalorder %s852_s25, 0 }
  0x44   : > { %s176_s18 = sand.u32 (!%p853_p8), 1, %s615_s10   ;;  %p854_p13 = scmp.ne.s32.totalorder (!%p853_p8), %s848_s20, 0 }
  0x45   : > { %174 = sbr.rel (%p853_p8) target bundleno = 556 (0x22c), region = 28  ;;  %s436_s19 = sshll.u32 (!%p853_p8), %s176_s18, 4 }
  0x46   : > { %s177_s26 = scalar_lea.sflag (!%p853_p8), [#allocation8], %s176_s18  ;;  %s180_s28 = scalar_lea.vmem (!%p853_p8), [#allocation7], %s436_s19 }
  0x4c   : > { %602 = dma.done.wait (%p854_p13), %s177_s26, 256  }
  0x4d   : > { %604 = vsyncadd (%p854_p13), %s177_s26, 4294967040  ;;  %s186_s5 = scalar_lea.sflag [#allocation10], %s176_s18  ;;  %s798_s29 = scalar_lea.vmem [#allocation9], %s436_s19 }
  0x4e   : > { %606 = dma.done.wait (%p854_p13), %s186_s5, 256  }
  0x4f   : > { %608 = vsyncadd (%p854_p13), %s186_s5, 4294967040  ;;  %v235_v0 = vlaneseq  ;;  %vm224_vm0 = vcmask 7168   ;;  %v635_v1 = vmov -inf   ;;  %v230_v4 = vld [vmem:[%s180_s28] sm:$0xff]  ;;  %v231_v5 = vld [vmem:[%s180_s28 + $0x8] sm:$0xff]  ;;  %v636_v8 = vmov 0  }
  0x50   : > { %225 = vst.msk [vmem:[#allocation2] sm:$0xff] %vm224_vm0, %v635_v1  ;;  %506 = vset.pattern.permute.xlu0 %v636_v8  ;;  %v637_v9 = vmov 0.0   ;;  %v233_v19 = vld [vmem:[%s798_s29 + $0x8] sm:$0xff]  ;;  %v232_v23 = vld [vmem:[%s798_s29] sm:$0xff]  ;;  %p216_p7 = scmp.lt.s32.totalorder %s623_s12, 1 }
  0x51   : > { %v236_v2 = vand.u32 127, %v235_v0  ;;  %226 = vst.msk [vmem:[#allocation3] sm:$0xff] %vm224_vm0, %v637_v9  ;;  %227 = vst.msk [vmem:[#allocation4] sm:$0xff] %vm224_vm0, %v637_v9  ;;  %v288_v27 = vmul.f32 %v232_v23, %v230_v4 }
  0x52   : > { %228 = vst.msk [vmem:[#allocation5] sm:$0xff] %vm224_vm0, %v637_v9  ;;  %229 = vst.msk [vmem:[#allocation6] sm:$0xff] %vm224_vm0, %v637_v9  ;;  %s863_s12 = smov (!%p216_p7, %s623_s12), 1 }
  0x53   : > { %v237_v3 = vadd.s32 128, %v236_v2  ;;  %s438_s20 = sshll.u32 %s863_s12, 3 }
  0x54   : > { %s219_s4 = scalar_lea.vmem %s845_s2, %s438_s20 }
  0x55   : > { %vm242_vm1 = vcmp.lt.s32.totalorder %v237_v3, 200 }
  0x56   : > { %v248_v6 = vsel %vm242_vm1, %v231_v5, -3.4028235e+38  ;;  %v250_v22 = vsel %vm242_vm1, %v231_v5, 0.0  ;;  %v252_v24 = vsel %vm242_vm1, %v233_v19, 0.0 }
  0x57   : > { %v254_v7 = vmax.f32 %v230_v4, %v248_v6  ;;  %v253_v10 = vld [vmem:[#allocation2] sm:$0xff]  ;;  %v282_v26 = vadd.f32 %v252_v24, %v232_v23  ;;  %v289_v28 = vmul.f32 %v252_v24, %v250_v22  ;;  %v296_v30 = vadd.f32 %v250_v22, %v230_v4 }
  0x58   : > { %v272_v33 = vld [vmem:[#allocation3] sm:$0xff]  ;;  %v281_v37 = vld [vmem:[#allocation4] sm:$0xff] }
  0x59   : > { %255 = vmax.xlane.f32.xlu0 %v254_v7  ;;  %v290_v29 = vadd.f32 %v289_v28, %v288_v27  ;;  %v287_v40 = vld [vmem:[#allocation5] sm:$0xff]  ;;  %v295_v44 = vld [vmem:[#allocation6] sm:$0xff] }
  0xe6   : > { %v256_v11 = vpop.xlane.xlu0 %255 }
  0xe7   : > { %v257_v12 = vmax.f32 %v253_v10, %v256_v11 }
  0xe9   : > { %v258_v13 = vsub.f32 %v253_v10, %v257_v12  ;;  %280 = vst.msk [vmem:[#allocation2] sm:$0xff] %vm224_vm0, %v257_v12  ;;  %263 = vperm.xlu0 %506, %v257_v12  }
  0xeb   : > { %v259_v31 = vmul.f32 1.442695, %v258_v13 }
  0xf0   : > { %v304_v53 = vld [vmem:[#allocation2] sm:$0xff] }
 0x168   : > { %v264_v14 = vpop.permute.xlu0 %263 }
 0x169   : > { %v266_v15 = vsub.f32 %v230_v4, %v264_v14  ;;  %v267_v16 = vsub.f32 %v248_v6, %v264_v14 }
 0x16b   : > { %v268_v17 = vmul.f32 1.442695, %v266_v15  ;;  %v270_v18 = vmul.f32 1.442695, %v267_v16 }
 0x16d   : > { %507 = vpow2.f32 %v268_v17 }
 0x16e   : > { %509 = vpow2.f32 %v270_v18 }
 0x16f   : > { %511 = vpow2.f32 %v259_v31 }
 0x177   : > { %v508_v20 = vpop.eup %507 }
 0x178   : > { %v510_v21 = vpop.eup %509 }
 0x179   : > { %v274_v25 = vadd.f32 %v510_v21, %v508_v20  ;;  %v512_v32 = vpop.eup %511 }
 0x17a   : > { %v273_v34 = vmul.f32 %v512_v32, %v272_v33 }
 0x17b   : > { %275 = vadd.xlane.f32.xlu1 %v274_v25 }
 0x17f   : > { %283 = vadd.xlane.f32.xlu1 %v282_v26 }
 0x183   : > { %291 = vadd.xlane.f32.xlu1 %v290_v29 }
 0x187   : > { %297 = vadd.xlane.f32.xlu1 %v296_v30 }
 0x208   : > { %v276_v35 = vpop.xlane.xlu1 %275 }
 0x209   : > { %v277_v36 = vadd.f32 %v276_v35, %v273_v34 }
 0x20b   : > { %279 = vst.msk [vmem:[#allocation3] sm:$0xff] %vm224_vm0, %v277_v36 }
 0x20c   : > { %v284_v38 = vpop.xlane.xlu1 %283 }
 0x20d   : > { %v285_v39 = vadd.f32 %v284_v38, %v281_v37 }
 0x20f   : > { %286 = vst.msk [vmem:[#allocation4] sm:$0xff] %vm224_vm0, %v285_v39 }
 0x210   : > { %v292_v41 = vpop.xlane.xlu1 %291 }
 0x211   : > { %v293_v42 = vadd.f32 %v292_v41, %v287_v40 }
 0x212   : > { %v305_v43 = vld [vmem:[#allocation3] sm:$0xff] }
 0x213   : > { %513 = vlog2.f32 %v305_v43  ;;  %294 = vst.msk [vmem:[#allocation5] sm:$0xff] %vm224_vm0, %v293_v42 }
 0x214   : > { %v298_v45 = vpop.xlane.xlu1 %297 }
 0x215   : > { %v299_v46 = vadd.f32 %v298_v45, %v295_v44 }
 0x216   : > { %v309_v47 = vld [vmem:[#allocation4] sm:$0xff] }
 0x217   : > { %v310_v48 = vadd.f32 1e-08, %v309_v47  ;;  %300 = vst.msk [vmem:[#allocation6] sm:$0xff] %vm224_vm0, %v299_v46  ;;  %vm320_vm2 = vcmp.eq.f32.partialorder %v309_v47, 0.0 }
 0x219   : > { %515 = vrcp.f32 %v310_v48 }
 0x21a   : > { %v314_v57 = vld [vmem:[#allocation5] sm:$0xff] }
 0x21d   : > { %v514_v49 = vpop.eup %513 }
 0x21e   : > { %v307_v50 = vmul.f32 0.6931472, %v514_v49  ;;  %v317_v51 = vld [vmem:[#allocation6] sm:$0xff] }
 0x21f   : > { %v318_v56 = vmul.f32 0.005, %v317_v51 }
 0x220   : > { %v308_v54 = vadd.f32 %v307_v50, %v304_v53 }
 0x222   : > { %v319_v61 = vsub.f32 %v308_v54, %v318_v56 }
 0x223   : > { %v516_v52 = vpop.eup %515 }
 0x224   : > { %v312_v55 = vmul.f32 %v516_v52, %v309_v47  ;;  %v315_v59 = vmul.f32 %v516_v52, %v314_v57 }
 0x226   : > { %v313_v58 = vmul.f32 %v312_v55, %v308_v54 }
 0x228   : > { %v316_v60 = vsub.f32 %v313_v58, %v315_v59 }
 0x22a   : > { %v321_v62 = vsel %vm320_vm2, %v319_v61, %v316_v60 }
 0x22b   : > { %322 = vst.msk [vmem:[%s219_s4] sm:$0xff] %vm224_vm0, %v321_v62 }
 0x22c PF: > { %s18_s14 = sadd.s32 1, %s631_s14   ;;  %s855_s9 = smov %s615_s10 }
 0x22d   : > { %p15_p9 = scmp.ge.s32.totalorder %s18_s14, 4   ;;  %s856_s10 = smov %s619_s11 }
 0x22e   : > { %s857_s11 = smov %s702_s21  ;;  %s858_s12 = smov %s627_s13 }
 0x22f   : > { %s859_s13 = smov %s861_s16  ;;  %17 = sbr.rel (!%p15_p9) target bundleno = 6 (0x6), region = 89 }
 0x236   :  { %342 = vsyncpa [#allocation8], 1 }
 0x237   :  { %344 = vsyncpa [#allocation8 + $0x1], 1 }
 0x238   :  { %345 = vsyncpa [#allocation10], 1 }
 0x239   :  { %347 = vsyncpa [#allocation10 + $0x1], 1 }

</bundles_post_ra>
